<compile_context>
chip_gen: v7x
topology: tpu7x:2x2x1
jax: 0.10.0
libtpu: 0.0.40
codegen_flags: <defaults>
</compile_context>

<pallas_src>
import functools

import jax
import jax.numpy as jnp
from jax.experimental import pallas as pl
from jax.experimental.pallas import tpu as pltpu


def _rmsnorm_kernel(x_ref, scale_ref, o_ref, *, eps):
    # x_ref:     (tile_rows, hidden)
    # scale_ref: (1, hidden)  -- pre-cast to f32 in the wrapper, resident block
    # o_ref:     (tile_rows, hidden)
    x_f32 = x_ref[...].astype(jnp.float32)
    # variance = mean(x^2) along hidden, in fp32 (matches torch .to(float32))
    variance = jnp.mean(x_f32 * x_f32, axis=-1, keepdims=True)
    inv = jax.lax.rsqrt(variance + eps)  # EUP op, off the VALU critical path
    # Fused: (x * rsqrt(var+eps)) * scale, computed in f32, cast once on store.
    o_ref[...] = (x_f32 * inv * scale_ref[...]).astype(o_ref.dtype)


def _round_up(x, m):
    return ((x + m - 1) // m) * m


def _sublane_multiple(dtype):
    itemsize = jnp.dtype(dtype).itemsize
    if itemsize >= 4:
        return 8
    if itemsize == 2:
        return 16
    return 32


def _vmem_capacity_bytes():
    # Conservative fallback = v7x physical VMEM (64 MiB); v5e/v6e have 128 MiB.
    try:
        return int(pltpu.get_tpu_info().vmem_capacity_bytes)
    except Exception:
        return 64 * 1024 * 1024


def _choose_tile_rows(hidden, in_itemsize, out_itemsize):
    vmem = _vmem_capacity_bytes()
    # Budget ~45% of physical VMEM for the double-buffered x/out tiles, leaving
    # headroom for the resident scale block and compiler scratch.
    budget = int(vmem * 0.45)
    per_row = 2 * (in_itemsize + out_itemsize) * hidden  # double-buffered
    return max(1, budget // max(per_row, 1))


def rms_norm(x, scale, eps=1e-6, *, tile_rows=None, out_dtype=None):
    """RMSNorm forward.  x: (..., hidden), scale: (hidden,)."""
    orig_shape = x.shape
    hidden = orig_shape[-1]
    rows = 1
    for d in orig_shape[:-1]:
        rows *= d
    x2d = x.reshape(rows, hidden)

    # Output dtype follows the PyTorch semantics:
    #   if scale is fp16/bf16 -> output is scale.dtype; otherwise the fp32
    #   normalized activations times scale (fp32 for fp32 scale).
    if out_dtype is None:
        if scale.dtype in (jnp.float16, jnp.bfloat16):
            out_dtype = scale.dtype
        else:
            out_dtype = jnp.promote_types(scale.dtype, jnp.float32)
    out_dtype = jnp.dtype(out_dtype)

    # Hoist the scale cast out of the per-tile hot path: pass it as f32.
    scale2d = scale.reshape(1, hidden).astype(jnp.float32)

    in_itemsize = jnp.dtype(x.dtype).itemsize
    out_itemsize = out_dtype.itemsize
    sublane = _sublane_multiple(x.dtype)

    if tile_rows is None:
        # Largest tile that fits the VMEM budget ...
        tile_rows = _choose_tile_rows(hidden, in_itemsize, out_itemsize)
        # ... but keep enough grid steps for megacore sharding / pipelining.
        min_grid_steps = 8
        max_tile_for_grid = _round_up(pl.cdiv(rows, min_grid_steps), sublane)
        tile_rows = min(tile_rows, max_tile_for_grid, 1024)
    # Sublane-align (8 f32 / 16 bf16 / 32 int8) and never exceed the
    # (rounded-up) row count.
    tile_rows = max(sublane, _round_up(tile_rows, sublane))
    tile_rows = min(tile_rows, _round_up(rows, sublane))

    # Arbitrary row counts: pad to a multiple of tile_rows instead of forcing
    # tiny tiles.  Zero rows normalize to finite values and are sliced off.
    grid_steps = pl.cdiv(rows, tile_rows)
    padded_rows = grid_steps * tile_rows
    if padded_rows != rows:
        x2d = jnp.pad(x2d, ((0, padded_rows - rows), (0, 0)))

    # Scoped-VMEM limit sized to the actual double-buffered working set
    # (defaults of 16/32 MiB would otherwise cap big tiles).
    x_tile_bytes = tile_rows * hidden * in_itemsize
    o_tile_bytes = tile_rows * hidden * out_itemsize
    scale_bytes = hidden * 4
    needed = 2 * (x_tile_bytes + o_tile_bytes) + 2 * scale_bytes
    vmem_limit = min(needed + (4 << 20), int(_vmem_capacity_bytes() * 0.9))
    vmem_limit = max(vmem_limit, 16 << 20)

    kernel = functools.partial(_rmsnorm_kernel, eps=eps)

    out2d = pl.pallas_call(
        kernel,
        out_shape=jax.ShapeDtypeStruct((padded_rows, hidden), out_dtype),
        grid_spec=pltpu.PrefetchScalarGridSpec(
            num_scalar_prefetch=0,
            grid=(grid_steps,),
            in_specs=[
                pl.BlockSpec((tile_rows, hidden), lambda i: (i, 0)),
                pl.BlockSpec((1, hidden), lambda i: (0, 0)),
            ],
            out_specs=pl.BlockSpec((tile_rows, hidden), lambda i: (i, 0)),
        ),
        compiler_params=pltpu.CompilerParams(
            dimension_semantics=("parallel",),
            vmem_limit_bytes=int(vmem_limit),
        ),
    )(x2d, scale2d)

    if padded_rows != rows:
        out2d = out2d[:rows]
    return out2d.reshape(orig_shape[:-1] + (hidden,))


if __name__ == "__main__":
    batch, seq, hidden = 2, 8, 32
    eps = 1e-6

    key = jax.random.PRNGKey(0)
    x = jax.random.normal(key, (batch, seq, hidden), dtype=jnp.float32)

    # Parameter init matches nn.Parameter(torch.ones(hidden_size))
    scale = jnp.ones((hidden,), dtype=jnp.float32)

    out = rms_norm(x, scale, eps=eps)
    out = jax.block_until_ready(out)

    # Reference check (plain JAX, same math as the PyTorch forward)
    x_f32 = x.astype(jnp.float32)
    var = jnp.mean(x_f32 * x_f32, axis=-1, keepdims=True)
    ref = scale * (x_f32 * jax.lax.rsqrt(var + eps))

    assert out.shape == (batch, seq, hidden)
    assert out.dtype == ref.dtype
    assert jnp.allclose(out, ref, atol=1e-5, rtol=1e-5), "mismatch vs reference"

    # Odd (non-divisible) row count exercises the cdiv + padding path.
    x_odd = jax.random.normal(jax.random.PRNGKey(1), (3, 7, hidden), jnp.float32)
    out_odd = jax.block_until_ready(rms_norm(x_odd, scale, eps=eps))
    var_o = jnp.mean(x_odd * x_odd, axis=-1, keepdims=True)
    ref_o = scale * (x_odd * jax.lax.rsqrt(var_o + eps))
    assert jnp.allclose(out_odd, ref_o, atol=1e-5, rtol=1e-5), "odd-rows mismatch"

    # bf16 path (scale bf16 -> output bf16, matching the PyTorch cast rule).
    xb = jax.random.normal(jax.random.PRNGKey(2), (batch, seq, hidden),
                           dtype=jnp.bfloat16)
    sb = jnp.ones((hidden,), dtype=jnp.bfloat16)
    out_b = jax.block_until_ready(rms_norm(xb, sb, eps=eps))
    xb_f32 = xb.astype(jnp.float32)
    var_b = jnp.mean(xb_f32 * xb_f32, axis=-1, keepdims=True)
    ref_b = (sb.astype(jnp.float32) *
             (xb_f32 * jax.lax.rsqrt(var_b + eps))).astype(jnp.bfloat16)
    assert out_b.dtype == jnp.bfloat16
    assert jnp.allclose(out_b.astype(jnp.float32), ref_b.astype(jnp.float32),
                        atol=2e-2, rtol=2e-2), "bf16 mismatch"

    print("KERNEL_OK")
</pallas_src>

<mosaic_0001>
module attributes {stable_mosaic.version = 11 : i64} {
  func.func @_rmsnorm_kernel(%arg0: i32, %arg1: memref<8x32xf32, #tpu.memory_space<vmem>>, %arg2: memref<1x32xf32, #tpu.memory_space<vmem>>, %arg3: memref<8x32xf32, #tpu.memory_space<vmem>>) attributes {dimension_semantics = [#tpu.dimension_semantics<parallel>], iteration_bounds = array<i64: 2>, scalar_prefetch = 0 : i64, scratch_operands = 0 : i64, tpu.core_type = #tpu.core_type<tc>, window_params = [{transform_indices = @transform_0, window_bounds = array<i64: 8, 32>}, {pipeline_mode = #tpu.pipeline_mode<synchronous>, transform_indices = @transform_1, window_bounds = array<i64: 1, 32>}, {transform_indices = @transform_2, window_bounds = array<i64: 8, 32>}]} {
    %c0 = arith.constant 0 : index
    %c0_0 = arith.constant 0 : index
    %0 = vector.load %arg1[%c0, %c0_0] : memref<8x32xf32, #tpu.memory_space<vmem>>, vector<8x32xf32>
    %1 = arith.mulf %0, %0 : vector<8x32xf32>
    %cst = arith.constant dense<0.000000e+00> : vector<8xf32>
    %2 = vector.multi_reduction <add>, %1, %cst [1] : vector<8x32xf32> to vector<8xf32>
    %3 = vector.shape_cast %2 : vector<8xf32> to vector<8x1xf32>
    %cst_1 = arith.constant 3.200000e+01 : f32
    %4 = vector.broadcast %cst_1 : f32 to vector<8x1xf32>
    %5 = arith.divf %3, %4 : vector<8x1xf32>
    %cst_2 = arith.constant 9.99999997E-7 : f32
    %6 = vector.broadcast %cst_2 : f32 to vector<8x1xf32>
    %7 = arith.addf %5, %6 : vector<8x1xf32>
    %8 = math.rsqrt %7 : vector<8x1xf32>
    %9 = vector.broadcast %8 : vector<8x1xf32> to vector<8x32xf32>
    %10 = arith.mulf %0, %9 : vector<8x32xf32>
    %c0_3 = arith.constant 0 : index
    %c0_4 = arith.constant 0 : index
    %11 = vector.load %arg2[%c0_3, %c0_4] : memref<1x32xf32, #tpu.memory_space<vmem>>, vector<1x32xf32>
    %12 = vector.broadcast %11 : vector<1x32xf32> to vector<8x32xf32>
    %13 = arith.mulf %10, %12 : vector<8x32xf32>
    %c0_5 = arith.constant 0 : index
    %c0_6 = arith.constant 0 : index
    %14 = vector.load %arg3[%c0_5, %c0_6] : memref<8x32xf32, #tpu.memory_space<vmem>>, vector<8x32xf32>
    tpu.vector_store %arg3[%c0_5, %c0_6], %13 {strides = array<i32>} : memref<8x32xf32, #tpu.memory_space<vmem>>, vector<8x32xf32>,
    return
  }
  func.func @transform_0(%arg0: i32) -> (i32, i32) {
    %c0_i32 = arith.constant 0 : i32
    %c0_i32_0 = arith.constant 0 : i32
    return %arg0, %c0_i32 : i32, i32
  }
  func.func @transform_1(%arg0: i32) -> (i32, i32) {
    %c0_i32 = arith.constant 0 : i32
    %c0_i32_0 = arith.constant 0 : i32
    %c0_i32_1 = arith.constant 0 : i32
    return %c0_i32, %c0_i32_0 : i32, i32
  }
  func.func @transform_2(%arg0: i32) -> (i32, i32) {
    %c0_i32 = arith.constant 0 : i32
    %c0_i32_0 = arith.constant 0 : i32
    return %arg0, %c0_i32 : i32, i32
  }
}

</mosaic_0001>

<bundles_post_ra>
// kernel: tpu_custom_call.1
= control target key start
LH: loop header
LB: loop body
LE: loop exit
PB: predicated region body
PF: predicated region fallthrough
CT: control target
= control target key end

     0   :  { %7 = vsyncpa [#allocation3], 0  ;;  %s605_s0 = inlined_call_operand.hbm [shape: f32[16,32], index: 0, kind: input, shape index: {}]   ;;  %s606_s1 = inlined_call_operand.vmem [shape: f32[1,32], index: 1, kind: input, shape index: {}]   ;;  %s607_s2 = inlined_call_operand.hbm [shape: f32[16,32], index: 2, kind: output, shape index: {}]  }
   0x1   :  { %9 = vsyncpa [#allocation3 + $0x1], 0 }
   0x2   :  { %10 = vsyncpa [#allocation4], 0 }
   0x3   :  { %12 = vsyncpa [#allocation4 + $0x1], 0  ;;  %s439_s9 = smov 0   ;;  %s441_s10 = smov 0  }
   0x4   :  { %s443_s11 = smov 0   ;;  %s445_s12 = smov 0  }
   0x5 LB: > { %s460_s13 = sadd.s32 4294967295, %s420_s12   ;;  %s263_s14 = sadd.s32 4294967294, %s420_s12   ;;  %s420_s12 = sphi %s445_s12, %s622_s12   ;;  %s416_s11 = sphi %s443_s11, %s621_s11   ;;  %s412_s10 = sphi %s441_s10, %s620_s10   ;;  %s408_s9 = sphi %s439_s9, %s619_s9  }
   0x6   : > { %s464_s15 = sadd.s32 1, %s420_s12   ;;  %s25_s16 = sadd.s32 1, %s416_s11 }
   0x7   : > { %s22_s17 = ssub.s32 %s420_s12, %s464_s15  ;;  %p32_p0 = scmp.ne.s32.totalorder %s416_s11, %s412_s10 }
   0x8   : > { %p23_p1 = scmp.eq.s32.totalorder %s22_s17, 0  ;;  %p33_p2 = scmp.eq.s32.totalorder %s420_s12, 0 }
   0x9   : > { %p38_p3 = scmp.ne.s32.totalorder %s412_s10, %s408_s9  ;;  %p39_p4 = scmp.eq.s32.totalorder %s460_s13, 0 }
   0xa   : > { %s476_s18 = scalar_select %p23_p1, %s416_s11, %s25_s16  }
   0xb   : > { %p478_p5 = por %p33_p2, %p32_p0  ;;  %p482_p6 = por %p39_p4, %p38_p3 }
   0xc   : > { %p83_p7 = scmp.eq.s32.totalorder %s460_s13, 1  ;;  %p89_p8 = scmp.eq.s32.totalorder %s263_s14, 1 }
   0xd   : > { %p288_p10 = scmp.lt.s32.totalorder %s420_s12, 2  ;;  %s112_s23 = sand.u32 1, %s416_s11  }
   0xe   : > { %p489_p11 = por %p83_p7, %p32_p0  ;;  %p493_p12 = por %p89_p8, %p38_p3 }
   0xf   : > { %s267_s24 = sshll.u32 %s420_s12, 7  ;;  %s266_s25 = sshll.u32 %s112_s23, 3 }
  0x10   : > { %s611_s21 = scalar_select %p489_p11, 1, 0 }
  0x11   : > { %s612_s22 = scalar_select %p493_p12, 1, 0 }
  0x12   : > { %s502_s28 = scalar_lea.hbm %s605_s0, %s267_s24  ;;  %s116_s29 = scalar_lea.vmem [#allocation2], %s266_s25 }
  0x13   : > { %s123_s30 = sshll.u32 %s116_s29, 4  ;;  %p506_p13 = pnand %p288_p10, %p478_p5  ;;  %s510_s30 = int_to_ptr.vmem [resolvable:$true] %s123_s30 }
  0x14   : > { %s113_s4 = scalar_lea.sflag [#allocation3], %s112_s23  ;;  %s324_s5 = scalar_lea.hbm %s502_s28, 128 }
  0x15   : > { %p325_p2 = scmp.ne.s32.totalorder %s502_s28, %s324_s5  ;;  %p326_p3 = pneg %p506_p13 }
  0x16   : > { %s329_s8 = scalar_lea.hbm %s605_s0, 256  ;;  %p330_p5 = scmp.lt.u32.totalorder %s502_s28, %s605_s0 }
  0x17   : > { %p327_p4 = pnand %p326_p3, %p325_p2  ;;  %p331_p8 = scmp.lt.u32.totalorder %s329_s8, %s324_s5 }
  0x18   : > { %p333_p9 = scmp.lt.u32.totalorder %s324_s5, %s502_s28 }
  0x19   : > { %p328_p7 = pneg %p327_p4  ;;  %p332_p10 = por %p331_p8, %p330_p5 }
  0x1b   : > { %p334_p0 = por %p333_p9, %p332_p10 }
  0x1d   : > { %p335_p1 = pnand %p334_p0, %p328_p7 }
  0x1f   : > { %338 = shalt.err (!%p335_p1)
}
  0x20   : > { %s339_s17 = scalar_lea.vmem %s510_s30, 128  ;;  %s422_s19 = smov [#allocation2]  }
  0x21   : > { %p340_p2 = scmp.ne.s32.totalorder %s510_s30, %s339_s17  ;;  %s344_s23 = sshll.u32 %s422_s19, 4  ;;  %s345_s23 = int_to_ptr.vmem [resolvable:$false] %s344_s23 }
  0x22   : > { %s346_s24 = scalar_lea.vmem %s345_s23, 256  ;;  %p347_p11 = scmp.lt.s32.totalorder %s510_s30, %s345_s23 }
  0x23   : > { %p342_p4 = pnand %p340_p2, %p326_p3  ;;  %p348_p5 = scmp.lt.s32.totalorder %s346_s24, %s339_s17 }
  0x25   : > { %p343_p12 = pneg %p342_p4  ;;  %p349_p8 = por %p348_p5, %p347_p11 }
  0x27   : > { %p350_p9 = pnand %p349_p8, %p343_p12 }
  0x29   : > { %353 = shalt.err (!%p350_p9)
}
  0x2a   : > { %283 = dma.hbm_to_vmem [thread:$0]  (!%p506_p13), %s502_s28, 128, %s510_s30, %s113_s4  }
  0x2b   : > { %p614_p0 = scmp.lt.s32.totalorder %s420_s12, 3  ;;  %p615_p1 = scmp.ge.s32.totalorder %s420_s12, 1 }
  0x2d   : > { %p129_p3 = pnand %p615_p1, %p614_p0 }
  0x2e   : > { %s544_s25 = sand.u32 (!%p129_p3), 1, %s412_s10  }
  0x2f   : > { %132 = sbr.rel (%p129_p3) target bundleno = 234 (0xea), region = 28  ;;  %s269_s26 = sshll.u32 (!%p129_p3), %s544_s25, 3 }
  0x30   : > { %s135_s27 = scalar_lea.sflag (!%p129_p3), [#allocation3], %s544_s25  ;;  %s138_s29 = scalar_lea.vmem (!%p129_p3), [#allocation2], %s269_s26 }
  0x36   : > { %399 = dma.done.wait (%p482_p6), %s135_s27, 128  }
  0x37   : > { %401 = vsyncadd (%p482_p6), %s135_s27, 4294967168  ;;  %v159_v0 = vld [vmem:[%s138_s29] sm:$0xff]  ;;  %vm161_vm0 = vcmask 261120   ;;  %s273_s20 = sshll.u32 %s460_s13, 7  ;;  %s158_s3 = scalar_lea.vmem [#allocation5], %s269_s26 }
  0x38   : > { %v160_v1 = vmul.f32 %v159_v0, %v159_v0  ;;  %v271_v7 = vld [vmem:[%s606_s1] ss:$0 sm:$0xff]  ;;  %s193_s4 = sshll.u32 %s158_s3, 4  ;;  %s560_s7 = scalar_lea.hbm %s607_s2, %s273_s20  ;;  %s562_s4 = int_to_ptr.vmem [resolvable:$true] %s193_s4 }
  0x39   : > { %s180_s8 = scalar_lea.sflag [#allocation4], %s544_s25  ;;  %s354_s14 = scalar_lea.vmem %s562_s4, 128 }
  0x3a   : > { %v162_v2 = vsel %vm161_vm0, %v160_v1, 0.0  ;;  %p355_p6 = scmp.ne.s32.totalorder %s562_s4, %s354_s14  ;;  %p616_p11 = scmp.ne.s32.totalorder %s611_s21, 0 }
  0x3b   : > { %163 = vadd.xlane.f32.xlu0 %v162_v2  ;;  %s423_s13 = smov [#allocation5]  }
  0x3c   : > { %p356_p12 = pnand %p355_p6, %p616_p11  ;;  %s358_s16 = sshll.u32 %s423_s13, 4  ;;  %s359_s16 = int_to_ptr.vmem [resolvable:$false] %s358_s16 }
  0x3d   : > { %s360_s17 = scalar_lea.vmem %s359_s16, 256  ;;  %p361_p7 = scmp.lt.s32.totalorder %s562_s4, %s359_s16 }
  0x3e   : > { %p357_p13 = pneg %p356_p12  ;;  %p362_p10 = scmp.lt.s32.totalorder %s360_s17, %s354_s14 }
  0x40   : > { %p363_p2 = por %p362_p10, %p361_p7 }
  0x42   : > { %p364_p4 = pnand %p363_p2, %p357_p13 }
  0xc8   : > { %v164_v3 = vpop.xlane.xlu0 %163 }
  0xc9   : > { %v166_v4 = vmul.f32 0.03125, %v164_v3 }
  0xcb   : > { %v167_v5 = vadd.f32 1e-06, %v166_v4 }
  0xcd   : > { %322 = vrsqrt.f32 %v167_v5 }
  0xd7   : > { %v323_v6 = vpop.eup %322 }
  0xd8   : > { %v169_v8 = vmul.f32 %v323_v6, %v159_v0 }
  0xda   : > { %v177_v9 = vmul.f32 %v271_v7, %v169_v8 }
  0xdc   : > { %178 = vst.msk [vmem:[%s158_s3] sm:$0xff] %vm161_vm0, %v177_v9 }
  0xdd   : > { %367 = shalt.err (!%p364_p4)
}
  0xde   : > { %s368_s19 = scalar_lea.hbm %s560_s7, 128  ;;  %s372_s25 = scalar_lea.hbm %s607_s2, 256 }
  0xdf   : > { %p369_p5 = scmp.ne.s32.totalorder %s560_s7, %s368_s19  ;;  %p373_p0 = scmp.lt.u32.totalorder %s560_s7, %s607_s2 }
  0xe0   : > { %p374_p1 = scmp.lt.u32.totalorder %s372_s25, %s368_s19  ;;  %p376_p6 = scmp.lt.u32.totalorder %s368_s19, %s560_s7 }
  0xe1   : > { %p370_p8 = pnand %p369_p5, %p616_p11 }
  0xe2   : > { %p375_p3 = por %p374_p1, %p373_p0 }
  0xe3   : > { %p371_p9 = pneg %p370_p8 }
  0xe4   : > { %p377_p12 = por %p376_p6, %p375_p3 }
  0xe6   : > { %p378_p13 = pnand %p377_p12, %p371_p9 }
  0xe8   : > { %381 = shalt.err (!%p378_p13)
}
  0xe9   : > { %278 = dma.vmem_to_hbm [thread:$0]  (%p616_p11), %s562_s4, 128, %s560_s7, %s180_s8  }
  0xea PF: > { %s205_s29 = sand.u32 1, %s408_s9   ;;  %p617_p7 = scmp.ne.s32.totalorder %s612_s22, 0 }
  0xeb   : > { %p618_p10 = scmp.ge.s32.totalorder %s420_s12, 2  ;;  %s206_s28 = scalar_lea.sflag [#allocation4], %s205_s29 }
  0xed   : > { %p285_p2 = pnand %p618_p10, %p617_p7 }
  0xef   : > { %403 = dma.done.wait (!%p285_p2), %s206_s28, 128  }
  0xf0   : > { %405 = vsyncadd (!%p285_p2), %s206_s28, 4294967168  ;;  %p15_p4 = scmp.ge.s32.totalorder %s464_s15, 4   ;;  %s619_s9 = smov %s412_s10 }
  0xf1   : > { %s620_s10 = smov %s416_s11  ;;  %s621_s11 = smov %s476_s18 }
  0xf2   : > { %s622_s12 = smov %s464_s15  ;;  %17 = sbr.rel (!%p15_p4) target bundleno = 5 (0x5), region = 73 }
  0xf9   :  { %211 = vsyncpa [#allocation3], 1 }
  0xfa   :  { %213 = vsyncpa [#allocation3 + $0x1], 1 }
  0xfb   :  { %214 = vsyncpa [#allocation4], 1 }
  0xfc   :  { %216 = vsyncpa [#allocation4 + $0x1], 1 }

</bundles_post_ra>
